<compile_context>
chip_gen: v6e
topology: v6e:2x2x1
jax: 0.10.0
libtpu: 0.0.40
codegen_flags: <defaults>
</compile_context>

<pallas_src>
import functools
import math

import jax
import jax.numpy as jnp
import numpy as np
from jax.experimental import pallas as pl
from jax.experimental.pallas import tpu as pltpu

LN_EPS = 1e-5


def _largest_divisor(n, cap):
    for d in range(min(n, cap), 0, -1):
        if n % d == 0:
            return d
    return 1


def _layernorm(v, g, b):
    mu = jnp.mean(v, axis=-1, keepdims=True)
    var = jnp.mean((v - mu) ** 2, axis=-1, keepdims=True)
    return (v - mu) * jax.lax.rsqrt(var + LN_EPS) * g + b


# ----------------------------------------------------------------------------
# 1) PromptLearner.forward ('end' position): prefix | ctx | suffix
# ----------------------------------------------------------------------------
def prompt_assemble_kernel(prefix_ref, ctx_ref, suffix_ref, o_ref):
    tb = prefix_ref.shape[0]
    n_ctx, d = ctx_ref.shape
    o_ref[:, 0:1, :] = prefix_ref[...]
    o_ref[:, 1:1 + n_ctx, :] = jnp.broadcast_to(ctx_ref[...][None], (tb, n_ctx, d))
    o_ref[:, 1 + n_ctx:, :] = suffix_ref[...]


def prompt_learner_forward(ctx, token_prefix, token_suffix, *, cls_block=8):
    # class_token_position == 'end', learned_cls == False (shared 2-D ctx).
    # TODO(synk): 'middle'/'front' positions and the 4-D template-ensemble /
    # learned_cls paths need ragged, name_lens-dependent concatenation ->
    # host-side glue.
    n_cls, _, D = token_prefix.shape
    n_ctx = ctx.shape[0]
    l_suf = token_suffix.shape[1]
    L = 1 + n_ctx + l_suf
    TB = _largest_divisor(n_cls, cls_block)
    return pl.pallas_call(
        prompt_assemble_kernel,
        out_shape=jax.ShapeDtypeStruct((n_cls, L, D), jnp.float32),
        grid_spec=pltpu.PrefetchScalarGridSpec(
            num_scalar_prefetch=0, grid=(n_cls // TB,),
            in_specs=[
                pl.BlockSpec((TB, 1, D), lambda i: (i, 0, 0)),
                pl.BlockSpec((n_ctx, D), lambda i: (0, 0)),
                pl.BlockSpec((TB, l_suf, D), lambda i: (i, 0, 0)),
            ],
            out_specs=pl.BlockSpec((TB, L, D), lambda i: (i, 0, 0))),
        compiler_params=pltpu.CompilerParams(dimension_semantics=("parallel",)),
    )(token_prefix, ctx, token_suffix)


# ----------------------------------------------------------------------------
# 2) Fused CLIP text transformer: one pallas_call, grid = (batch_blocks, layers)
# ----------------------------------------------------------------------------
def fused_encoder_kernel(x_ref, pos_ref, mask_ref,
                         ln1g_ref, ln1b_ref, wqkv_ref, bqkv_ref,
                         wout_ref, bout_ref, ln2g_ref, ln2b_ref,
                         wfc_ref, bfc_ref, wproj_ref, bproj_ref,
                         o_ref, *, num_heads):
    layer = pl.program_id(1)

    # Layer 0: fold the positional-embedding add into the first resblock.
    @pl.when(layer == 0)
    def _():
        o_ref[...] = x_ref[...] + pos_ref[...][None]

    x = o_ref[...]                                 # (TB, L, D), carried in VMEM
    TB, L, D = x.shape
    hd = D // num_heads
    scale = 1.0 / math.sqrt(hd)

    # ---- multi-head causal self-attention (pre-LN) ----
    h = _layernorm(x, ln1g_ref[...], ln1b_ref[...])
    h2d = h.reshape(TB * L, D).astype(jnp.bfloat16)          # bf16 MXU inputs
    qkv = (jnp.dot(h2d, wqkv_ref[...], preferred_element_type=jnp.float32)
           + bqkv_ref[...]).reshape(TB, L, 3 * D)
    q, k, v = qkv[..., :D], qkv[..., D:2 * D], qkv[..., 2 * D:]
    mask = mask_ref[...][None]                     # (1, L, L) — stays f32 (-1e9)

    heads = []
    for hh in range(num_heads):                    # static, tiny head count
        sl = slice(hh * hd, (hh + 1) * hd)
        s = jnp.einsum('bqd,bkd->bqk', q[..., sl], k[..., sl],
                       preferred_element_type=jnp.float32) * scale + mask
        s = s - jnp.max(s, axis=-1, keepdims=True)
        p = jnp.exp(s)                             # f32 softmax (v5e EUP is f32)
        p = p * pl.reciprocal(jnp.sum(p, axis=-1, keepdims=True), approx=True)
        heads.append(jnp.einsum('bqk,bkd->bqd', p, v[..., sl],
                                preferred_element_type=jnp.float32))
    attn = jnp.concatenate(heads, axis=-1).reshape(TB * L, D)
    attn = (jnp.dot(attn.astype(jnp.bfloat16), wout_ref[...],
                    preferred_element_type=jnp.float32) + bout_ref[...])
    x = x + attn.reshape(TB, L, D)

    # ---- MLP with QuickGELU ----
    h2 = _layernorm(x, ln2g_ref[...], ln2b_ref[...])
    h2 = h2.reshape(TB * L, D).astype(jnp.bfloat16)
    f = (jnp.dot(h2, wfc_ref[...], preferred_element_type=jnp.float32)
         + bfc_ref[...])
    f = f * jax.nn.sigmoid(1.702 * f)              # QuickGELU in f32
    f = (jnp.dot(f.astype(jnp.bfloat16), wproj_ref[...],
                 preferred_element_type=jnp.float32) + bproj_ref[...])
    o_ref[...] = x + f.reshape(TB, L, D)


def fused_text_transformer(x, params, *, seq_block=8):
    N, L, D = x.shape
    H = params['num_heads']
    LAYERS = params['wqkv'].shape[0]
    TB = _largest_divisor(N, seq_block)            # several sequences per step
    NB = N // TB

    def act_spec():
        return pl.BlockSpec((TB, L, D), lambda nb, l: (nb, 0, 0))

    def const_spec(shape):
        return pl.BlockSpec(shape, lambda nb, l: (0, 0))

    def layer_spec(shape):
        # stacked weights: indexed by the layer grid coord -> pipelined DMA
        return pl.BlockSpec((pl.Squeezed(),) + shape, lambda nb, l: (l, 0, 0))

    flops = LAYERS * (24 * N * L * D * D + 4 * N * L * L * D)
    transc = LAYERS * (N * H * L * L + 4 * N * L * D)
    w_bytes = LAYERS * 2 * (D * 3 * D + D * D + 2 * D * 4 * D)       # bf16
    b_bytes = LAYERS * 4 * (3 * D + D + 4 * D + D + 4 * D)            # f32
    act_bytes = 2 * 4 * N * L * D                                     # x in+out
    kern = functools.partial(fused_encoder_kernel, num_heads=H)

    return pl.pallas_call(
        kern,
        out_shape=jax.ShapeDtypeStruct((N, L, D), jnp.float32),
        grid_spec=pltpu.PrefetchScalarGridSpec(
            num_scalar_prefetch=0,
            grid=(NB, LAYERS),
            in_specs=[
                act_spec(),                         # prompts (resident over layers)
                const_spec((L, D)),                 # positional embedding
                const_spec((L, L)),                 # causal mask
                layer_spec((1, D)), layer_spec((1, D)),          # ln_1
                layer_spec((D, 3 * D)), layer_spec((1, 3 * D)),  # qkv proj
                layer_spec((D, D)), layer_spec((1, D)),          # out proj
                layer_spec((1, D)), layer_spec((1, D)),          # ln_2
                layer_spec((D, 4 * D)), layer_spec((1, 4 * D)),  # c_fc
                layer_spec((4 * D, D)), layer_spec((1, D)),      # c_proj
            ],
            out_specs=act_spec()),                  # carried activation block
        compiler_params=pltpu.CompilerParams(
            dimension_semantics=("parallel", "arbitrary"),
            vmem_limit_bytes=64 * 1024 * 1024),
        cost_estimate=pl.CostEstimate(flops=int(flops),
                                      transcendentals=int(transc),
                                      bytes_accessed=int(w_bytes + b_bytes + act_bytes)),
    )(x, params['pos'], params['mask'],
      params['ln1_g'], params['ln1_b'], params['wqkv'], params['bqkv'],
      params['wout'], params['bout'], params['ln2_g'], params['ln2_b'],
      params['wfc'], params['bfc'], params['wproj'], params['bproj'])


# ----------------------------------------------------------------------------
# 3) ln_final on EOT rows only + batched text_projection
# ----------------------------------------------------------------------------
def final_kernel(eot_ref, x_hbm, g_ref, b_ref, proj_ref, o_ref, rows_ref, sems):
    n = o_ref.shape[0]

    def row_copy(i):
        # gather ONLY the EOT row of sequence i: (1, D) HBM -> VMEM
        return pltpu.make_async_copy(
            x_hbm.at[i, pl.ds(eot_ref[i], 1)],
            rows_ref.at[pl.ds(i, 1), :],
            sems.at[i])

    for i in range(n):      # static; N is small here. TODO(synk): pl.loop for big N
        row_copy(i).start()
    for i in range(n):
        row_copy(i).wait()

    ln = _layernorm(rows_ref[...], g_ref[...], b_ref[...])
    o_ref[...] = jnp.dot(ln.astype(jnp.bfloat16), proj_ref[...],
                         preferred_element_type=jnp.float32)


def final_project(x, eot_idx, lnf_g, lnf_b, proj):
    N, L, D = x.shape
    Dout = proj.shape[1]
    return pl.pallas_call(
        final_kernel,
        out_shape=jax.ShapeDtypeStruct((N, Dout), jnp.float32),
        grid_spec=pltpu.PrefetchScalarGridSpec(
            num_scalar_prefetch=1,
            grid=(1,),
            in_specs=[
                pl.BlockSpec(memory_space=pl.ANY),                 # x stays in HBM
                pl.BlockSpec((1, D), lambda i, eot: (0, 0)),
                pl.BlockSpec((1, D), lambda i, eot: (0, 0)),
                pl.BlockSpec((D, Dout), lambda i, eot: (0, 0)),
            ],
            out_specs=pl.BlockSpec((N, Dout), lambda i, eot: (0, 0)),
            scratch_shapes=[pltpu.VMEM((N, D), jnp.float32),
                            pltpu.SemaphoreType.DMA((N,))]),
        compiler_params=pltpu.CompilerParams(dimension_semantics=("arbitrary",)),
    )(eot_idx, x, lnf_g, lnf_b, proj)


def text_encoder_forward(prompts, tokenized_prompts, params):
    x = fused_text_transformer(prompts, params)
    # EOT position = argmax of token ids (EOT id is the largest in CLIP's vocab)
    eot_idx = jnp.argmax(tokenized_prompts, axis=-1).astype(jnp.int32)
    return final_project(x, eot_idx, params['lnf_g'], params['lnf_b'], params['proj'])


# ----------------------------------------------------------------------------
# Parameters (stacked per-layer weights, bf16 weights / f32 biases & LN)
# ----------------------------------------------------------------------------
def init_params(key, L, D, num_heads, num_layers, Dout):
    def nxt():
        nonlocal key
        key, sub = jax.random.split(key)
        return sub

    def stack(shape, scale, dtype):
        return jnp.stack(
            [scale * jax.random.normal(nxt(), shape, jnp.float32)
             for _ in range(num_layers)], axis=0).astype(dtype)

    params = dict(
        pos=0.02 * jax.random.normal(nxt(), (L, D), jnp.float32),
        mask=jnp.where(jnp.tril(jnp.ones((L, L), bool)), 0.0, -1e9).astype(jnp.float32),
        num_heads=num_heads,
        ln1_g=jnp.ones((num_layers, 1, D), jnp.float32),
        ln1_b=jnp.zeros((num_layers, 1, D), jnp.float32),
        ln2_g=jnp.ones((num_layers, 1, D), jnp.float32),
        ln2_b=jnp.zeros((num_layers, 1, D), jnp.float32),
        wqkv=stack((D, 3 * D), 0.05, jnp.bfloat16),
        bqkv=stack((1, 3 * D), 0.01, jnp.float32),
        wout=stack((D, D), 0.05, jnp.bfloat16),
        bout=stack((1, D), 0.01, jnp.float32),
        wfc=stack((D, 4 * D), 0.05, jnp.bfloat16),
        bfc=stack((1, 4 * D), 0.01, jnp.float32),
        wproj=stack((4 * D, D), 0.05, jnp.bfloat16),
        bproj=stack((1, D), 0.01, jnp.float32),
        lnf_g=jnp.ones((1, D), jnp.float32),
        lnf_b=jnp.zeros((1, D), jnp.float32),
        proj=(0.05 * jax.random.normal(nxt(), (D, Dout), jnp.float32)).astype(jnp.bfloat16),
    )
    return params


# ----------------------------------------------------------------------------
# Pure-JAX references
# ----------------------------------------------------------------------------
def reference_prompts(ctx, token_prefix, token_suffix):
    n_cls = token_prefix.shape[0]
    n_ctx, D = ctx.shape
    return jnp.concatenate(
        [token_prefix, jnp.broadcast_to(ctx[None], (n_cls, n_ctx, D)), token_suffix],
        axis=1)


def reference_text_encoder(prompts, tokenized_prompts, params):
    N, L, D = prompts.shape
    H = params['num_heads']
    hd = D // H
    f32 = lambda a: a.astype(jnp.float32)
    x = prompts + params['pos']
    for l in range(params['wqkv'].shape[0]):
        h = _layernorm(x, params['ln1_g'][l], params['ln1_b'][l])
        qkv = h @ f32(params['wqkv'][l]) + params['bqkv'][l]
        q, k, v = jnp.split(qkv, 3, axis=-1)
        qh = q.reshape(N, L, H, hd).transpose(0, 2, 1, 3)
        kh = k.reshape(N, L, H, hd).transpose(0, 2, 1, 3)
        vh = v.reshape(N, L, H, hd).transpose(0, 2, 1, 3)
        s = jnp.einsum('nhqd,nhkd->nhqk', qh, kh) / math.sqrt(hd) + params['mask']
        p = jax.nn.softmax(s, axis=-1)
        o = jnp.einsum('nhqk,nhkd->nhqd', p, vh).transpose(0, 2, 1, 3).reshape(N, L, D)
        x = x + (o @ f32(params['wout'][l]) + params['bout'][l])
        h2 = _layernorm(x, params['ln2_g'][l], params['ln2_b'][l])
        f = h2 @ f32(params['wfc'][l]) + params['bfc'][l]
        f = f * jax.nn.sigmoid(1.702 * f)
        x = x + (f @ f32(params['wproj'][l]) + params['bproj'][l])
    xl = _layernorm(x, params['lnf_g'], params['lnf_b'])
    eot = jnp.argmax(tokenized_prompts, axis=-1)
    return xl[jnp.arange(N), eot] @ f32(params['proj'])


# ----------------------------------------------------------------------------
if __name__ == "__main__":
    N_CLS, N_CTX, L_SUF = 8, 4, 3
    L = 1 + N_CTX + L_SUF                      # 8
    D, H, LAYERS, DOUT = 128, 4, 2, 128        # lane-dense D and Dout

    key = jax.random.PRNGKey(0)
    k_par, k_ctx, k_pre, k_suf, k_tok = jax.random.split(key, 5)

    params = init_params(k_par, L, D, H, LAYERS, DOUT)

    # PromptLearner state: learnable shared context + frozen prefix/suffix embeddings
    ctx = 0.02 * jax.random.normal(k_ctx, (N_CTX, D), jnp.float32)
    token_prefix = 0.02 * jax.random.normal(k_pre, (N_CLS, 1, D), jnp.float32)
    token_suffix = 0.02 * jax.random.normal(k_suf, (N_CLS, L_SUF, D), jnp.float32)

    # tokenized prompts: EOT token (largest id) at a per-class position
    tok = jax.random.randint(k_tok, (N_CLS, L), 1, 1000).astype(jnp.int32)
    eot_pos = jnp.array([7, 5, 6, 7, 4, 7, 3, 7], jnp.int32)
    tok = tok.at[jnp.arange(N_CLS), eot_pos].set(49407)

    # --- PromptLearner.forward (class_token_position='end') ---
    prompts = jax.block_until_ready(
        prompt_learner_forward(ctx, token_prefix, token_suffix, cls_block=4))
    prompts_ref = reference_prompts(ctx, token_prefix, token_suffix)
    np.testing.assert_array_equal(np.asarray(prompts), np.asarray(prompts_ref))

    # --- downstream CLIP text encoder consuming the assembled prompts ---
    feats = jax.block_until_ready(text_encoder_forward(prompts, tok, params))
    feats_ref = reference_text_encoder(prompts_ref, tok, params)
    assert feats.shape == (N_CLS, DOUT)
    # bf16 weights/activation casts inside the kernel -> slightly looser tolerance
    np.testing.assert_allclose(np.asarray(feats), np.asarray(feats_ref),
                               rtol=3e-2, atol=3e-2)

    print("KERNEL_OK")
</pallas_src>

<mosaic_0001>
module attributes {stable_mosaic.version = 11 : i64} {
  func.func @prompt_assemble_kernel(%arg0: i32, %arg1: memref<4x1x128xf32, #tpu.memory_space<vmem>>, %arg2: memref<4x128xf32, #tpu.memory_space<vmem>>, %arg3: memref<4x3x128xf32, #tpu.memory_space<vmem>>, %arg4: memref<4x8x128xf32, #tpu.memory_space<vmem>>) attributes {dimension_semantics = [#tpu.dimension_semantics<parallel>], iteration_bounds = array<i64: 2>, scalar_prefetch = 0 : i64, scratch_operands = 0 : i64, tpu.core_type = #tpu.core_type<tc>, window_params = [{transform_indices = @transform_0, window_bounds = array<i64: 4, 1, 128>}, {pipeline_mode = #tpu.pipeline_mode<synchronous>, transform_indices = @transform_1, window_bounds = array<i64: 4, 128>}, {transform_indices = @transform_2, window_bounds = array<i64: 4, 3, 128>}, {transform_indices = @transform_3, window_bounds = array<i64: 4, 8, 128>}]} {
    %c0 = arith.constant 0 : index
    %c0_0 = arith.constant 0 : index
    %c0_1 = arith.constant 0 : index
    %0 = vector.load %arg1[%c0, %c0_0, %c0_1] : memref<4x1x128xf32, #tpu.memory_space<vmem>>, vector<4x1x128xf32>
    %c0_2 = arith.constant 0 : index
    %c0_3 = arith.constant 0 : index
    %c0_4 = arith.constant 0 : index
    %1 = vector.load %arg4[%c0_2, %c0_3, %c0_4] : memref<4x8x128xf32, #tpu.memory_space<vmem>>, vector<4x1x128xf32>
    tpu.vector_store %arg4[%c0_2, %c0_3, %c0_4], %0 {strides = array<i32>} : memref<4x8x128xf32, #tpu.memory_space<vmem>>, vector<4x1x128xf32>,
    %c0_5 = arith.constant 0 : index
    %c0_6 = arith.constant 0 : index
    %2 = vector.load %arg2[%c0_5, %c0_6] : memref<4x128xf32, #tpu.memory_space<vmem>>, vector<4x128xf32>
    %3 = vector.shape_cast %2 : vector<4x128xf32> to vector<1x4x128xf32>
    %4 = vector.shape_cast %3 : vector<1x4x128xf32> to vector<1x4x128xf32>
    %5 = vector.broadcast %4 : vector<1x4x128xf32> to vector<4x4x128xf32>
    %c0_7 = arith.constant 0 : index
    %c1 = arith.constant 1 : index
    %c0_8 = arith.constant 0 : index
    %6 = vector.load %arg4[%c0_7, %c1, %c0_8] : memref<4x8x128xf32, #tpu.memory_space<vmem>>, vector<4x4x128xf32>
    tpu.vector_store %arg4[%c0_7, %c1, %c0_8], %5 {strides = array<i32>} : memref<4x8x128xf32, #tpu.memory_space<vmem>>, vector<4x4x128xf32>,
    %c0_9 = arith.constant 0 : index
    %c0_10 = arith.constant 0 : index
    %c0_11 = arith.constant 0 : index
    %7 = vector.load %arg3[%c0_9, %c0_10, %c0_11] : memref<4x3x128xf32, #tpu.memory_space<vmem>>, vector<4x3x128xf32>
    %c0_12 = arith.constant 0 : index
    %c5 = arith.constant 5 : index
    %c0_13 = arith.constant 0 : index
    %8 = vector.load %arg4[%c0_12, %c5, %c0_13] : memref<4x8x128xf32, #tpu.memory_space<vmem>>, vector<4x3x128xf32>
    tpu.vector_store %arg4[%c0_12, %c5, %c0_13], %7 {strides = array<i32>} : memref<4x8x128xf32, #tpu.memory_space<vmem>>, vector<4x3x128xf32>,
    return
  }
  func.func @transform_0(%arg0: i32) -> (i32, i32, i32) {
    %c0_i32 = arith.constant 0 : i32
    %c0_i32_0 = arith.constant 0 : i32
    %c0_i32_1 = arith.constant 0 : i32
    return %arg0, %c0_i32, %c0_i32_0 : i32, i32, i32
  }
  func.func @transform_1(%arg0: i32) -> (i32, i32) {
    %c0_i32 = arith.constant 0 : i32
    %c0_i32_0 = arith.constant 0 : i32
    %c0_i32_1 = arith.constant 0 : i32
    return %c0_i32, %c0_i32_0 : i32, i32
  }
  func.func @transform_2(%arg0: i32) -> (i32, i32, i32) {
    %c0_i32 = arith.constant 0 : i32
    %c0_i32_0 = arith.constant 0 : i32
    %c0_i32_1 = arith.constant 0 : i32
    return %arg0, %c0_i32, %c0_i32_0 : i32, i32, i32
  }
  func.func @transform_3(%arg0: i32) -> (i32, i32, i32) {
    %c0_i32 = arith.constant 0 : i32
    %c0_i32_0 = arith.constant 0 : i32
    %c0_i32_1 = arith.constant 0 : i32
    return %arg0, %c0_i32, %c0_i32_0 : i32, i32, i32
  }
}

</mosaic_0001>

<bundles_post_ra>
// kernel: tpu_custom_call.1
= control target key start
LH: loop header
LB: loop body
LE: loop exit
PB: predicated region body
PF: predicated region fallthrough
CT: control target
= control target key end

     0   :  { %8 = vsyncpa [#allocation3], 0  ;;  %s548_s0 = inlined_call_operand.vmem [shape: f32[8,1,128], index: 0, kind: input, shape index: {}]   ;;  %s549_s1 = inlined_call_operand.vmem [shape: f32[4,128], index: 1, kind: input, shape index: {}]   ;;  %s550_s2 = inlined_call_operand.vmem [shape: f32[8,3,128], index: 2, kind: input, shape index: {}]   ;;  %s551_s3 = inlined_call_operand.hbm [shape: f32[8,8,128], index: 3, kind: output, shape index: {}]  }
   0x1   :  { %10 = vsyncpa [#allocation3 + $0x1], 0  ;;  %s437_s12 = smov 0   ;;  %s439_s13 = smov 0  }
   0x2   :  { %s441_s14 = smov 0   ;;  %s443_s15 = smov 0  }
   0x3 LB: > { %s458_s16 = sadd.s32 4294967295, %s412_s15   ;;  %s297_s17 = sadd.s32 4294967294, %s412_s15   ;;  %s412_s15 = sphi %s443_s15, %s557_s15   ;;  %s408_s14 = sphi %s441_s14, %s556_s14   ;;  %s404_s13 = sphi %s439_s13, %s555_s13   ;;  %s400_s12 = sphi %s437_s12, %s554_s12  }
   0x4   : > { %s462_s18 = sadd.s32 1, %s412_s15   ;;  %s96_s19 = sadd.s32 1, %s408_s14 }
   0x5   : > { %s93_s20 = ssub.s32 %s412_s15, %s462_s18  ;;  %p106_p0 = scmp.ne.s32.totalorder %s408_s14, %s404_s13 }
   0x6   : > { %p94_p1 = scmp.eq.s32.totalorder %s93_s20, 0  ;;  %p107_p2 = scmp.eq.s32.totalorder %s458_s16, 1 }
   0x7   : > { %p112_p3 = scmp.ne.s32.totalorder %s404_s13, %s400_s12  ;;  %p113_p4 = scmp.eq.s32.totalorder %s297_s17, 1 }
   0x8   : > { %s473_s21 = scalar_select %p94_p1, %s408_s14, %s96_s19  }
   0x9   : > { %p475_p5 = por %p107_p2, %p106_p0  ;;  %p479_p6 = por %p113_p4, %p112_p3 }
   0xa   : > { %p300_p7 = scmp.ge.s32.totalorder %s412_s15, 1  ;;  %p151_p8 = scmp.lt.s32.totalorder %s412_s15, 3 }
   0xc   : > { %p152_p9 = pnand %p300_p7, %p151_p8 }
   0xd   : > { %s176_s24 = sand.u32 (!%p152_p9), 1, %s404_s13   ;;  %s302_s25 = sshll.u32 (!%p152_p9), %s458_s16, 2 }
   0xe   : > { %155 = sbr.rel (%p152_p9) target bundleno = 46 (0x2e), region = 32  ;;  %s301_s28 = sshll.u32 (!%p152_p9), %s176_s24, 5 }
   0xf   : > { %p180_p10 = scmp.lt.s32.totalorder (!%p152_p9), %s302_s25, 7  ;;  %s178_s29 = scalar_lea.vmem (!%p152_p9), [#allocation2], %s301_s28 }
  0x10   : > { %s310_s30 = sshll.u32 (!%p152_p9), %s458_s16, 9  ;;  %s226_s4 = sshll.u32 (!%p152_p9), %s178_s29, 4  ;;  %s504_s4 = int_to_ptr.vmem [resolvable:$true] %s226_s4 }
  0x11   : > { %s502_s19 = scalar_lea.hbm (!%p152_p9), %s551_s3, %s310_s30  ;;  %s508_s20 = scalar_lea.sflag (!%p152_p9), [#allocation3], %s176_s24 }
  0x12   : > { %s414_s26 = smov (!%p152_p9), [#allocation2]  }
  0x13   : > { %v199_v0 = vld [vmem:[%s549_s1] sm:$0xf]  ;;  %s559_s25 = smov (!%p180_p10, %s302_s25), 7  ;;  %s356_s27 = sshll.u32 %s414_s26, 4  ;;  %s357_s27 = int_to_ptr.vmem [resolvable:$false] %s356_s27 }
  0x14   : > { %200 = vst [vmem:[%s178_s29 + $0x1] sm:$0xf] %v199_v0  ;;  %201 = vst [vmem:[%s178_s29 + $0x9] sm:$0xf] %v199_v0  ;;  %s182_s7 = scalar_lea.vmem %s548_s0, %s559_s25  ;;  %s304_s8 = sshll.u32 %s559_s25, 2 }
  0x15   : > { %202 = vst [vmem:[%s178_s29 + $0x11] sm:$0xf] %v199_v0  ;;  %203 = vst [vmem:[%s178_s29 + $0x19] sm:$0xf] %v199_v0  ;;  %v191_v1 = vld [vmem:[%s182_s7] sm:$0x1]  ;;  %s188_s11 = scalar_lea.vmem %s550_s2, %s304_s8  ;;  %p359_p0 = scmp.lt.s32.totalorder %s504_s4, %s357_s27 }
  0x16   : > { %v192_v2 = vld [vmem:[%s182_s7 + $0x1] sm:$0x1]  ;;  %v193_v3 = vld [vmem:[%s182_s7 + $0x2] sm:$0x1]  ;;  %195 = vst [vmem:[%s178_s29] sm:$0x1] %v191_v1  ;;  %s352_s25 = scalar_lea.vmem %s504_s4, 512 }
  0x17   : > { %196 = vst [vmem:[%s178_s29 + $0x8] sm:$0x1] %v192_v2  ;;  %197 = vst [vmem:[%s178_s29 + $0x10] sm:$0x1] %v193_v3  ;;  %v194_v4 = vld [vmem:[%s182_s7 + $0x3] sm:$0x1]  ;;  %p353_p11 = scmp.ne.s32.totalorder %s504_s4, %s352_s25 }
  0x18   : > { %v204_v5 = vld [vmem:[%s188_s11] sm:$0x7]  ;;  %v205_v6 = vld [vmem:[%s188_s11 + $0x4] sm:$0x7]  ;;  %198 = vst [vmem:[%s178_s29 + $0x18] sm:$0x1] %v194_v4 }
  0x19   : > { %208 = vst [vmem:[%s178_s29 + $0x5] sm:$0x7] %v204_v5  ;;  %209 = vst [vmem:[%s178_s29 + $0xd] sm:$0x7] %v205_v6  ;;  %v206_v7 = vld [vmem:[%s188_s11 + $0x8] sm:$0x7]  ;;  %p354_p12 = pnand %p353_p11, %p475_p5 }
  0x1a   : > { %v207_v8 = vld [vmem:[%s188_s11 + $0xc] sm:$0x7]  ;;  %210 = vst [vmem:[%s178_s29 + $0x15] sm:$0x7] %v206_v7  ;;  %s358_s28 = scalar_lea.vmem %s357_s27, 1024 }
  0x1b   : > { %211 = vst [vmem:[%s178_s29 + $0x1d] sm:$0x7] %v207_v8  ;;  %p355_p13 = pneg %p354_p12  ;;  %p360_p1 = scmp.lt.s32.totalorder %s358_s28, %s352_s25 }
  0x1d   : > { %p361_p2 = por %p360_p1, %p359_p0 }
  0x1f   : > { %p362_p3 = pnand %p361_p2, %p355_p13 }
  0x21   : > { %365 = shalt.err (!%p362_p3)
}
  0x22   : > { %s366_s24 = scalar_lea.hbm %s502_s19, 512  ;;  %s370_s5 = scalar_lea.hbm %s551_s3, 1024 }
  0x23   : > { %p367_p4 = scmp.ne.s32.totalorder %s502_s19, %s366_s24  ;;  %p371_p9 = scmp.lt.s32.totalorder %s502_s19, %s551_s3 }
  0x24   : > { %p372_p10 = scmp.lt.s32.totalorder %s370_s5, %s366_s24 }
  0x25   : > { %p368_p7 = pnand %p367_p4, %p475_p5 }
  0x26   : > { %p373_p11 = por %p372_p10, %p371_p9 }
  0x27   : > { %p369_p8 = pneg %p368_p7 }
  0x29   : > { %p374_p12 = pnand %p373_p11, %p369_p8 }
  0x2b   : > { %377 = shalt.err (!%p374_p12)
}
  0x2c   : > { %s415_s8 = smov 128   ;;  %s416_s9 = smov 8  }
  0x2d   : > { %311 = dma.vmem_to_hbm [thread:$0]  (%p475_p5), %s504_s4, 512, %s502_s19, %s508_s20, %s415_s8, %s415_s8, %s416_s9  }
  0x2e PF: > { %p317_p13 = scmp.ge.s32.totalorder %s412_s15, 2  ;;  %s241_s10 = sand.u32 1, %s400_s12  }
  0x2f   : > { %s242_s11 = scalar_lea.sflag [#allocation3], %s241_s10 }
  0x30   : > { %p314_p0 = pnand %p317_p13, %p479_p6 }
  0x32   : > { %p315_p1 = pneg %p314_p0 }
  0x34   : > { %395 = dma.done.wait (%p315_p1), %s242_s11, 512  }
  0x35   : > { %397 = vsyncadd (%p315_p1), %s242_s11, 4294966784  ;;  %p13_p2 = scmp.ge.s32.totalorder %s462_s18, 4   ;;  %s554_s12 = smov %s404_s13 }
  0x36   : > { %s555_s13 = smov %s408_s14  ;;  %s556_s14 = smov %s473_s21 }
  0x37   : > { %s557_s15 = smov %s462_s18  ;;  %15 = sbr.rel (!%p13_p2) target bundleno = 3 (0x3), region = 70 }
  0x3c   :  { %247 = vsyncpa [#allocation3], 1 }
  0x3d   :  { %249 = vsyncpa [#allocation3 + $0x1], 1 }

</bundles_post_ra>
